<compile_context>
chip_gen: v7x
topology: tpu7x:2x2x1
jax: 0.10.0
libtpu: 0.0.40
codegen_flags: <defaults>
</compile_context>

<pallas_src>
import functools

import jax
import jax.numpy as jnp
from jax import lax
from jax.experimental import pallas as pl
from jax.experimental.pallas import tpu as pltpu


def _sharp_block_kernel(x_ref, o_ref, *, W):
    """Depthwise 3x3 sharpen + ReLU on a block of flattened images.

    x_ref, o_ref: (B, H*W) -- one row per (n, c) image, spatial dims flattened
    so the (fast) lane dimension is H*W.
    """
    B, HW = o_ref.shape
    xf = x_ref[...].astype(jnp.float32)            # single load of the block

    flat = lax.broadcasted_iota(jnp.int32, (B, HW), 1)
    col = flat % W                                  # column inside each image row

    # Separable 3x3 sum.  Vertical taps = lane rotations by +-W (XLU),
    # zeroed on the first / last image row (also removes the circular wrap).
    up = jnp.where(flat < W, 0.0, pltpu.roll(xf, W, axis=1))              # x[y-1, x]
    down = jnp.where(flat >= HW - W, 0.0, pltpu.roll(xf, HW - W, axis=1))  # x[y+1, x]
    s = (xf + up) + down                            # 3-tap column sums

    # Horizontal taps = lane rotations by +-1, zeroed at the left / right image
    # edge (this also removes bleed across flattened row boundaries / the wrap).
    left = jnp.where(col == 0, 0.0, pltpu.roll(s, 1, axis=1))              # s[y, x-1]
    right = jnp.where(col == W - 1, 0.0, pltpu.roll(s, HW - 1, axis=1))    # s[y, x+1]
    sum3x3 = (s + left) + right

    # Fixed sharpen kernel: 8*center - (8 neighbours) == 9*center - sum3x3.
    y = 9.0 * xf - sum3x3
    o_ref[...] = jnp.maximum(y, 0.0).astype(o_ref.dtype)


@functools.partial(jax.jit, static_argnames=("target_block_bytes",))
def sharp_block(x_nchw, target_block_bytes=2 * 1024 * 1024):
    """Forward pass of SharpBlock.  Input/output: NCHW (PyTorch convention)."""
    N, C, H, W = x_nchw.shape
    NC = N * C
    HW = H * W
    itemsize = jnp.dtype(x_nchw.dtype).itemsize
    bytes_per_image = HW * itemsize

    # Images (one per (n, c) pair) per grid step, sized from a per-block byte
    # budget: big enough to amortize the ~0.35us/step overhead, small enough
    # that the double-buffered in+out working set stays inside v7x's VMEM.
    budget_imgs = max(1, target_block_bytes // bytes_per_image)
    if budget_imgs >= NC:
        # Whole problem fits in one block.  Split in two when that keeps the
        # blocks 8-row aligned, so v7x can shard the grid over both TCs.
        B = NC // 2 if NC % 16 == 0 else NC
    elif budget_imgs >= 8:
        B = (budget_imgs // 8) * 8        # 8-row (sublane) aligned blocks
    else:
        # TODO(synk): for very large H*W add a row-tiled grid axis with a
        # 1-row halo so VMEM per step is bounded independent of image size.
        B = 8 if NC >= 8 else NC
    grid = (pl.cdiv(NC, B),)

    # (N, C, H, W) -> (N*C, H*W): free row-major reshape, no transpose, and it
    # makes the lane dim H*W (lane-dense even when W << 128).
    x = x_nchw.reshape(NC, HW)

    out = pl.pallas_call(
        functools.partial(_sharp_block_kernel, W=W),
        out_shape=jax.ShapeDtypeStruct((NC, HW), x_nchw.dtype),
        grid=grid,
        in_specs=[pl.BlockSpec((B, HW), lambda i: (i, 0))],
        out_specs=pl.BlockSpec((B, HW), lambda i: (i, 0)),
        compiler_params=pltpu.CompilerParams(
            dimension_semantics=("parallel",),
            vmem_limit_bytes=32 * 1024 * 1024),
        cost_estimate=pl.CostEstimate(
            flops=15 * NC * HW,
            transcendentals=0,
            bytes_accessed=2 * NC * HW * itemsize),
    )(x)
    return out.reshape(N, C, H, W)


def _reference_sharp_block(x_nchw):
    """Pure-JAX reference (grouped lax conv) for verification."""
    C = x_nchw.shape[1]
    k = jnp.array([[-1., -1., -1.],
                   [-1.,  8., -1.],
                   [-1., -1., -1.]], jnp.float32)
    w = jnp.tile(k[None, None], (C, 1, 1, 1))   # OIHW, groups=C
    y = jax.lax.conv_general_dilated(
        x_nchw, w, window_strides=(1, 1), padding="SAME",
        dimension_numbers=("NCHW", "OIHW", "NCHW"),
        feature_group_count=C)
    return jnp.maximum(y, 0.0)


if __name__ == "__main__":
    key = jax.random.PRNGKey(0)
    N, C, H, W = 2, 4, 16, 16
    x = jax.random.normal(key, (N, C, H, W), jnp.float32)

    out = jax.block_until_ready(sharp_block(x))

    ref = _reference_sharp_block(x)
    assert out.shape == (N, C, H, W)
    assert jnp.max(jnp.abs(out - ref)) < 1e-4

    print("KERNEL_OK")
</pallas_src>

<mosaic_0001>
module attributes {stable_mosaic.version = 11 : i64} {
  func.func @_sharp_block_kernel(%arg0: i32, %arg1: memref<8x256xf32, #tpu.memory_space<vmem>>, %arg2: memref<8x256xf32, #tpu.memory_space<vmem>>) attributes {dimension_semantics = [#tpu.dimension_semantics<parallel>], iteration_bounds = array<i64: 1>, scalar_prefetch = 0 : i64, scratch_operands = 0 : i64, tpu.core_type = #tpu.core_type<tc>, window_params = [{transform_indices = @transform_0, window_bounds = array<i64: 8, 256>}, {transform_indices = @transform_1, window_bounds = array<i64: 8, 256>}]} {
    %c0 = arith.constant 0 : index
    %c0_0 = arith.constant 0 : index
    %0 = vector.load %arg1[%c0, %c0_0] : memref<8x256xf32, #tpu.memory_space<vmem>>, vector<8x256xf32>
    %1 = tpu.iota {dimensions = array<i32: 1>} : vector<8x256xi32>
    %c16_i32 = arith.constant 16 : i32
    %c0_i32 = arith.constant 0 : i32
    %2 = arith.cmpi eq, %c16_i32, %c0_i32 : i32
    %c1_i32 = arith.constant 1 : i32
    %3 = arith.select %2, %c1_i32, %c16_i32 : i32
    %4 = vector.broadcast %3 : i32 to vector<8x256xi32>
    %5 = arith.remsi %1, %4 : vector<8x256xi32>
    %c0_i32_1 = arith.constant 0 : i32
    %6 = vector.broadcast %c0_i32_1 : i32 to vector<8x256xi32>
    %7 = arith.cmpi ne, %5, %6 : vector<8x256xi32>
    %c0_i32_2 = arith.constant 0 : i32
    %8 = vector.broadcast %c0_i32_2 : i32 to vector<8x256xi32>
    %9 = arith.cmpi slt, %5, %8 : vector<8x256xi32>
    %c0_i32_3 = arith.constant 0 : i32
    %10 = arith.cmpi slt, %3, %c0_i32_3 : i32
    %11 = vector.broadcast %10 : i1 to vector<8x256xi1>
    %12 = vector.broadcast %11 : vector<8x256xi1> to vector<8x256xi1>
    %13 = arith.xori %9, %12 : vector<8x256xi1>
    %14 = arith.andi %13, %7 : vector<8x256xi1>
    %15 = vector.broadcast %3 : i32 to vector<8x256xi32>
    %16 = arith.addi %5, %15 : vector<8x256xi32>
    %17 = arith.select %14, %16, %5 : vector<8x256xi1>, vector<8x256xi32>
    %c16_i32_4 = arith.constant 16 : i32
    %18 = vector.broadcast %c16_i32_4 : i32 to vector<8x256xi32>
    %19 = arith.cmpi slt, %1, %18 : vector<8x256xi32>
    %c16_i32_5 = arith.constant 16 : i32
    %20 = tpu.dynamic_rotate %0 by %c16_i32_5 dim 1 : vector<8x256xf32>, i32 -> vector<8x256xf32>
    %cst = arith.constant 0.000000e+00 : f32
    %21 = vector.broadcast %cst : f32 to vector<8x256xf32>
    %22 = arith.select %19, %21, %20 : vector<8x256xi1>, vector<8x256xf32>
    %c240_i32 = arith.constant 240 : i32
    %23 = vector.broadcast %c240_i32 : i32 to vector<8x256xi32>
    %24 = arith.cmpi sge, %1, %23 : vector<8x256xi32>
    %c240_i32_6 = arith.constant 240 : i32
    %25 = tpu.dynamic_rotate %0 by %c240_i32_6 dim 1 : vector<8x256xf32>, i32 -> vector<8x256xf32>
    %cst_7 = arith.constant 0.000000e+00 : f32
    %26 = vector.broadcast %cst_7 : f32 to vector<8x256xf32>
    %27 = arith.select %24, %26, %25 : vector<8x256xi1>, vector<8x256xf32>
    %28 = arith.addf %0, %22 : vector<8x256xf32>
    %29 = arith.addf %28, %27 : vector<8x256xf32>
    %c0_i32_8 = arith.constant 0 : i32
    %30 = vector.broadcast %c0_i32_8 : i32 to vector<8x256xi32>
    %31 = arith.cmpi eq, %17, %30 : vector<8x256xi32>
    %c1_i32_9 = arith.constant 1 : i32
    %32 = tpu.dynamic_rotate %29 by %c1_i32_9 dim 1 : vector<8x256xf32>, i32 -> vector<8x256xf32>
    %cst_10 = arith.constant 0.000000e+00 : f32
    %33 = vector.broadcast %cst_10 : f32 to vector<8x256xf32>
    %34 = arith.select %31, %33, %32 : vector<8x256xi1>, vector<8x256xf32>
    %c15_i32 = arith.constant 15 : i32
    %35 = vector.broadcast %c15_i32 : i32 to vector<8x256xi32>
    %36 = arith.cmpi eq, %17, %35 : vector<8x256xi32>
    %c255_i32 = arith.constant 255 : i32
    %37 = tpu.dynamic_rotate %29 by %c255_i32 dim 1 : vector<8x256xf32>, i32 -> vector<8x256xf32>
    %cst_11 = arith.constant 0.000000e+00 : f32
    %38 = vector.broadcast %cst_11 : f32 to vector<8x256xf32>
    %39 = arith.select %36, %38, %37 : vector<8x256xi1>, vector<8x256xf32>
    %40 = arith.addf %29, %34 : vector<8x256xf32>
    %41 = arith.addf %40, %39 : vector<8x256xf32>
    %cst_12 = arith.constant 9.000000e+00 : f32
    %42 = vector.broadcast %cst_12 : f32 to vector<8x256xf32>
    %43 = arith.mulf %42, %0 : vector<8x256xf32>
    %44 = arith.subf %43, %41 : vector<8x256xf32>
    %cst_13 = arith.constant 0.000000e+00 : f32
    %45 = vector.broadcast %cst_13 : f32 to vector<8x256xf32>
    %46 = arith.maximumf %44, %45 : vector<8x256xf32>
    %c0_14 = arith.constant 0 : index
    %c0_15 = arith.constant 0 : index
    %47 = vector.load %arg2[%c0_14, %c0_15] : memref<8x256xf32, #tpu.memory_space<vmem>>, vector<8x256xf32>
    tpu.vector_store %arg2[%c0_14, %c0_15], %46 {strides = array<i32>} : memref<8x256xf32, #tpu.memory_space<vmem>>, vector<8x256xf32>,
    return
  }
  func.func @transform_0(%arg0: i32) -> (i32, i32) {
    %c0_i32 = arith.constant 0 : i32
    %c0_i32_0 = arith.constant 0 : i32
    return %arg0, %c0_i32 : i32, i32
  }
  func.func @transform_1(%arg0: i32) -> (i32, i32) {
    %c0_i32 = arith.constant 0 : i32
    %c0_i32_0 = arith.constant 0 : i32
    return %arg0, %c0_i32 : i32, i32
  }
}

</mosaic_0001>

<bundles_post_ra>
// kernel: sharp_block.1
= control target key start
LH: loop header
LB: loop body
LE: loop exit
PB: predicated region body
PF: predicated region fallthrough
CT: control target
= control target key end

     0   :  { %s104_s8 = smov 112   ;;  %s105_s9 = smov 16   ;;  %v10_v2 = vlaneseq  ;;  %s130_s0 = inlined_call_operand.vmem [shape: f32[8,256], index: 0, kind: input, shape index: {}]   ;;  %s131_s1 = inlined_call_operand.vmem [shape: f32[8,256], index: 1, kind: output, shape index: {}]  }
   0x1   :  { %v8_v0 = vld [vmem:[%s130_s0] sm:$0xff]  ;;  %v9_v1 = vld [vmem:[%s130_s0 + $0x8] sm:$0xff]  ;;  %s106_s0 = smov 1   ;;  %s107_s12 = smov 127  }
   0x2   :  { %49 = vrot.lane.b32.xlu1 %v8_v0, %s104_s8  ;;  %39 = vrot.lane.b32.xlu0 %v8_v0, %s105_s9  ;;  %v11_v3 = vand.u32 127, %v10_v2  ;;  %v88_v28 = vmul.f32 9.0, %v8_v0  ;;  %v89_v29 = vmul.f32 9.0, %v9_v1 }
   0x4   :  { %v12_v4 = vadd.s32 128, %v11_v3  ;;  %vm53_vm0 = vcmp.lt.s32.totalorder %v11_v3, 112  ;;  %vm37_vm1 = vcmp.lt.s32.totalorder %v11_v3, 16  ;;  %v17_v19 = vand.u32 15, %v11_v3 }
   0x5   :  { %vm68_vm3 = vcmp.lt.s32.totalorder %v11_v3, 1  ;;  %vm79_vm6 = vcmp.lt.s32.totalorder %v11_v3, 127 }
   0x6   :  { %51 = vrot.lane.b32.xlu1 %v9_v1, %s104_s8  ;;  %41 = vrot.lane.b32.xlu0 %v9_v1, %s105_s9  ;;  %vm48_vm2 = vcmp.ge.s32.totalorder %v12_v4, 240  ;;  %v24_v20 = vand.u32 15, %v12_v4  ;;  %vm62_vm4 = vcmp.eq.s32.totalorder %v17_v19, 0  ;;  %vm73_vm7 = vcmp.eq.s32.totalorder %v17_v19, 15 }
   0x8   :  { %vm63_vm5 = vcmp.eq.s32.totalorder %v24_v20, 0  ;;  %vm74_vm8 = vcmp.eq.s32.totalorder %v24_v20, 15 }
  0x74   :  { %v50_v5 = vpop.permute.xlu1 %49  ;;  %v40_v6 = vpop.permute.xlu0 %39 }
  0x78   :  { %v52_v7 = vpop.permute.xlu1 %51  ;;  %v42_v8 = vpop.permute.xlu0 %41 }
  0x79   :  { %v55_v9 = vsel %vm53_vm0, %v52_v7, %v50_v5  ;;  %v43_v10 = vsel %vm37_vm1, %v40_v6, %v42_v8  ;;  %v44_v11 = vsel %vm37_vm1, %v42_v8, %v40_v6  ;;  %v54_v16 = vsel %vm53_vm0, %v50_v5, %v52_v7 }
  0x7a   :  { %v57_v12 = vsel %vm48_vm2, 0.0, %v55_v9  ;;  %v45_v13 = vsel %vm37_vm1, 0.0, %v44_v11  ;;  %v59_v14 = vadd.f32 %v43_v10, %v9_v1 }
  0x7b   :  { %v58_v15 = vadd.f32 %v45_v13, %v8_v0 }
  0x7c   :  { %v61_v17 = vadd.f32 %v59_v14, %v57_v12 }
  0x7d   :  { %v60_v18 = vadd.f32 %v58_v15, %v54_v16 }
  0x7e   :  { %66 = vrot.lane.b32.xlu1 %v61_v17, %s106_s0 }
  0x7f   :  { %64 = vrot.lane.b32.xlu0 %v60_v18, %s106_s0 }
  0x82   :  { %77 = vrot.lane.b32.xlu1 %v61_v17, %s107_s12 }
  0x83   :  { %75 = vrot.lane.b32.xlu0 %v60_v18, %s107_s12 }
  0xf0   :  { %v67_v21 = vpop.permute.xlu1 %66 }
  0xf1   :  { %v65_v22 = vpop.permute.xlu0 %64 }
  0xf2   :  { %v69_v23 = vsel %vm68_vm3, %v65_v22, %v67_v21  ;;  %v70_v24 = vsel %vm68_vm3, %v67_v21, %v65_v22 }
  0xf3   :  { %v71_v25 = vsel %vm62_vm4, 0.0, %v70_v24  ;;  %v72_v26 = vsel %vm63_vm5, 0.0, %v69_v23 }
  0xf4   :  { %v78_v27 = vpop.permute.xlu1 %77  ;;  %v84_v31 = vadd.f32 %v71_v25, %v60_v18  ;;  %v85_v32 = vadd.f32 %v72_v26, %v61_v17 }
  0xf5   :  { %v76_v30 = vpop.permute.xlu0 %75 }
  0xf6   :  { %v80_v33 = vsel %vm79_vm6, %v76_v30, %v78_v27  ;;  %v81_v34 = vsel %vm79_vm6, %v78_v27, %v76_v30 }
  0xf7   :  { %v82_v35 = vsel %vm73_vm7, 0.0, %v80_v33  ;;  %v83_v36 = vsel %vm74_vm8, 0.0, %v81_v34 }
  0xf8   :  { %v86_v37 = vadd.f32 %v84_v31, %v82_v35  ;;  %v87_v38 = vadd.f32 %v85_v32, %v83_v36 }
  0xfa   :  { %v90_v39 = vsub.f32 %v88_v28, %v86_v37  ;;  %v91_v40 = vsub.f32 %v89_v29, %v87_v38 }
  0xfc   :  { %v92_v41 = vmax.f32 %v90_v39, 0.0  ;;  %v93_v42 = vmax.f32 %v91_v40, 0.0 }
  0xfe   :  { %94 = vst [vmem:[%s131_s1] sm:$0xff] %v92_v41  ;;  %95 = vst [vmem:[%s131_s1 + $0x8] sm:$0xff] %v93_v42 }

</bundles_post_ra>
